<compile_context>
chip_gen: v7x
topology: tpu7x:2x2x1
jax: 0.10.0
libtpu: 0.0.40
codegen_flags: <defaults>
</compile_context>

<pallas_src>
import functools

import jax
import jax.numpy as jnp
from jax.experimental import pallas as pl
from jax.experimental.pallas import tpu as pltpu

_LANE = 128
_SUBLANE = 8
# (2, 2048, 128) f32 block = 2 MiB; in + out double-buffered = 8 MiB of VMEM,
# safely under the 16 MiB (v5e) / 32 MiB (v6e/v7x) scoped defaults on every generation.
_MAX_TILE_ROWS = 2048


def _round_up(n, m):
    return ((n + m - 1) // m) * m


# ----------------------------------------------------------------------------------------
# RHS kernel: f(z, t) = z @ W.T     (the module's forward)
# ----------------------------------------------------------------------------------------
def _linear_odef_kernel(w_ref, x_ref, o_ref):
    # w_ref: (4,) f32 in SMEM = W flattened row-major ([out, in] layout): w00, w01, w10, w11
    # x_ref/o_ref: (2, TILE_R, 128) feature-major blocks in VMEM; x_ref[f] is a dense
    #              (TILE_R, 128) slab holding feature f for TILE_R*128 batch elements.
    x0 = x_ref[0].astype(jnp.float32)
    x1 = x_ref[1].astype(jnp.float32)

    w00 = w_ref[0]
    w01 = w_ref[1]
    w10 = w_ref[2]
    w11 = w_ref[3]

    # out[:, b] = W @ x[:, b]  == (x @ W.T) in the PyTorch [B, 2] layout.
    # Pure VPU broadcast FMAs; full-tile dense stores (no masked sublane writes).
    o_ref[0] = (w00 * x0 + w01 * x1).astype(o_ref.dtype)
    o_ref[1] = (w10 * x0 + w11 * x1).astype(o_ref.dtype)


def linear_odef_forward_fm(x_fm, W, *, tile_r=None):
    """Feature-major forward: x_fm has shape (2, R, 128) with R % 8 == 0.

    Zero wrapper-side layout plumbing -- use this entry point from an ODE loop that keeps
    its state in the feature-major layout.  Returns the same (2, R, 128) layout.
    """
    D, R, L = x_fm.shape
    assert D == 2 and L == _LANE and R % _SUBLANE == 0
    if tile_r is None:
        tile_r = min(_MAX_TILE_ROWS, R)
    grid_n = (R + tile_r - 1) // tile_r  # exact-divide in this script; edge blocks are
    #                                      elementwise-per-column so padding is benign.

    w_flat = W.reshape(-1).astype(jnp.float32)  # 4 scalars -> SMEM

    return pl.pallas_call(
        _linear_odef_kernel,
        out_shape=jax.ShapeDtypeStruct((D, R, L), x_fm.dtype),
        grid_spec=pl.GridSpec(
            grid=(grid_n,),
            in_specs=[
                # W as 4 scalars in SMEM (no VMEM tile / extra DMA stream for the weights)
                pl.BlockSpec(memory_space=pltpu.MemorySpace.SMEM),
                # feature-major x block: (2, tile_r, 128), last two dims (8,128)-aligned
                pl.BlockSpec((D, tile_r, L), lambda i: (0, i, 0)),
            ],
            out_specs=pl.BlockSpec((D, tile_r, L), lambda i: (0, i, 0)),
        ),
        compiler_params=pltpu.CompilerParams(
            dimension_semantics=("parallel",),  # batch tiles shard across TCs on v7x
        ),
    )(w_flat, x_fm)


def _to_feature_major(x, rows_p):
    """[B, 2] -> feature-major (2, rows_p, 128), zero-padded along the batch lanes."""
    B, D = x.shape
    Bp = rows_p * _LANE
    return jnp.pad(x, ((0, Bp - B), (0, 0))).T.reshape(D, rows_p, _LANE)


def _from_feature_major(x_fm, B):
    D, rows_p, L = x_fm.shape
    return x_fm.reshape(D, rows_p * L).T[:B]


def _tile_rows_for_batch(B):
    rows = (B + _LANE - 1) // _LANE                     # 128-lane rows per feature
    tile_r = min(_MAX_TILE_ROWS, _round_up(rows, _SUBLANE))
    rows_p = _round_up(rows, tile_r)                    # grid divides exactly
    return tile_r, rows_p


def linear_odef_forward(x, t, W):
    """Forward of LinearODEF: returns x @ W.T  (t is ignored, matching the PyTorch module)."""
    del t  # unused in the forward pass, same as the PyTorch module
    B, D = x.shape
    assert D == 2 and W.shape == (D, D)
    tile_r, rows_p = _tile_rows_for_batch(B)
    # Single layout-plumbing step.  TODO(synk): in a real ODE solve, keep z in the
    # feature-major layout (or fully on-chip via linear_odef_euler) so this is not per-step.
    x_fm = _to_feature_major(x, rows_p)
    out_fm = linear_odef_forward_fm(x_fm, W, tile_r=tile_r)
    return _from_feature_major(out_fm, B)


# ----------------------------------------------------------------------------------------
# Fused explicit-Euler integrator: the whole time loop in one pallas_call, z stays on-chip.
# ----------------------------------------------------------------------------------------
def _euler_kernel(w_ref, z0_ref, zT_ref, *, n_steps, dt):
    w00 = w_ref[0]
    w01 = w_ref[1]
    w10 = w_ref[2]
    w11 = w_ref[3]

    z0 = z0_ref[0].astype(jnp.float32)
    z1 = z0_ref[1].astype(jnp.float32)

    def body(_, carry):
        a, b = carry
        f0 = w00 * a + w01 * b
        f1 = w10 * a + w11 * b
        return (a + dt * f0, b + dt * f1)

    z0f, z1f = jax.lax.fori_loop(0, n_steps, body, (z0, z1))
    zT_ref[0] = z0f.astype(zT_ref.dtype)
    zT_ref[1] = z1f.astype(zT_ref.dtype)


def linear_odef_euler(z0, W, *, dt, n_steps):
    """Integrate dz/dt = z @ W.T with explicit Euler for n_steps of size dt.

    One HBM read of z(0) and one HBM write of z(T) per batch block; the state stays in
    vregs/VMEM for all intermediate steps (no per-step HBM round-trip or kernel launch).
    """
    B, D = z0.shape
    assert D == 2 and W.shape == (D, D)
    tile_r, rows_p = _tile_rows_for_batch(B)
    z_fm = _to_feature_major(z0, rows_p)
    w_flat = W.reshape(-1).astype(jnp.float32)

    out_fm = pl.pallas_call(
        functools.partial(_euler_kernel, n_steps=int(n_steps), dt=float(dt)),
        out_shape=jax.ShapeDtypeStruct((D, rows_p, _LANE), z0.dtype),
        grid_spec=pl.GridSpec(
            grid=(rows_p // tile_r,),
            in_specs=[
                pl.BlockSpec(memory_space=pltpu.MemorySpace.SMEM),
                pl.BlockSpec((D, tile_r, _LANE), lambda i: (0, i, 0)),
            ],
            out_specs=pl.BlockSpec((D, tile_r, _LANE), lambda i: (0, i, 0)),
        ),
        compiler_params=pltpu.CompilerParams(
            dimension_semantics=("parallel",),
        ),
    )(w_flat, z_fm)
    return _from_feature_major(out_fm, B)


if __name__ == "__main__":
    key = jax.random.PRNGKey(0)
    kx, kx2, kz = jax.random.split(key, 3)

    # Deterministic weight matrix (what the PyTorch ctor receives as W):
    # classic spiral dynamics matrix, shape [out_features, in_features] = [2, 2]
    W = jnp.array([[-0.1, -1.0],
                   [ 1.0, -0.1]], dtype=jnp.float32)

    # 1) forward (the module's semantics), small batch of 2-D states z(t)
    B = 8
    x = jax.random.normal(kx, (B, 2), dtype=jnp.float32)
    t = jnp.zeros((B, 1), dtype=jnp.float32)  # unused by forward, matching PyTorch
    out = jax.block_until_ready(linear_odef_forward(x, t, W))
    ref = x @ W.T
    assert out.shape == (B, 2)
    assert jnp.allclose(out, ref, atol=1e-5, rtol=1e-5), "mismatch vs reference (B=8)"

    # 2) non-lane-aligned batch exercises the padding path
    B2 = 200
    x2 = jax.random.normal(kx2, (B2, 2), dtype=jnp.float32)
    out2 = jax.block_until_ready(linear_odef_forward(x2, None, W))
    ref2 = x2 @ W.T
    assert out2.shape == (B2, 2)
    assert jnp.allclose(out2, ref2, atol=1e-5, rtol=1e-5), "mismatch vs reference (B=200)"

    # 3) fused Euler integration: full time loop on-chip, single kernel launch
    B3 = 16
    z0 = jax.random.normal(kz, (B3, 2), dtype=jnp.float32)
    n_steps, dt = 25, 0.05
    zT = jax.block_until_ready(linear_odef_euler(z0, W, dt=dt, n_steps=n_steps))
    z_ref = z0
    for _ in range(n_steps):
        z_ref = z_ref + dt * (z_ref @ W.T)
    assert zT.shape == (B3, 2)
    assert jnp.allclose(zT, z_ref, atol=1e-4, rtol=1e-4), "mismatch vs Euler reference"

    print("KERNEL_OK")
</pallas_src>

<mosaic_0001>
module attributes {stable_mosaic.version = 11 : i64} {
  func.func @_linear_odef_kernel(%arg0: i32, %arg1: memref<4xf32, #tpu.memory_space<smem>>, %arg2: memref<2x8x128xf32, #tpu.memory_space<vmem>>, %arg3: memref<2x8x128xf32, #tpu.memory_space<vmem>>) attributes {dimension_semantics = [#tpu.dimension_semantics<parallel>], iteration_bounds = array<i64: 1>, scalar_prefetch = 0 : i64, scratch_operands = 0 : i64, tpu.core_type = #tpu.core_type<tc>, window_params = [{transform_indices = @transform_0, window_bounds = array<i64: 4>}, {transform_indices = @transform_1, window_bounds = array<i64: 2, 8, 128>}, {transform_indices = @transform_2, window_bounds = array<i64: 2, 8, 128>}]} {
    %c0 = arith.constant 0 : index
    %c0_0 = arith.constant 0 : index
    %c0_1 = arith.constant 0 : index
    %0 = vector.load %arg2[%c0, %c0_0, %c0_1] : memref<2x8x128xf32, #tpu.memory_space<vmem>>, vector<1x8x128xf32>
    %1 = vector.shape_cast %0 : vector<1x8x128xf32> to vector<8x128xf32>
    %c1 = arith.constant 1 : index
    %c0_2 = arith.constant 0 : index
    %c0_3 = arith.constant 0 : index
    %2 = vector.load %arg2[%c1, %c0_2, %c0_3] : memref<2x8x128xf32, #tpu.memory_space<vmem>>, vector<1x8x128xf32>
    %3 = vector.shape_cast %2 : vector<1x8x128xf32> to vector<8x128xf32>
    %c0_4 = arith.constant 0 : index
    %4 = memref.load %arg1[%c0_4] : memref<4xf32, #tpu.memory_space<smem>>
    %c1_5 = arith.constant 1 : index
    %5 = memref.load %arg1[%c1_5] : memref<4xf32, #tpu.memory_space<smem>>
    %c2 = arith.constant 2 : index
    %6 = memref.load %arg1[%c2] : memref<4xf32, #tpu.memory_space<smem>>
    %c3 = arith.constant 3 : index
    %7 = memref.load %arg1[%c3] : memref<4xf32, #tpu.memory_space<smem>>
    %8 = vector.broadcast %4 : f32 to vector<8x128xf32>
    %9 = arith.mulf %8, %1 : vector<8x128xf32>
    %10 = vector.broadcast %5 : f32 to vector<8x128xf32>
    %11 = arith.mulf %10, %3 : vector<8x128xf32>
    %12 = arith.addf %9, %11 : vector<8x128xf32>
    %c0_6 = arith.constant 0 : index
    %c0_7 = arith.constant 0 : index
    %c0_8 = arith.constant 0 : index
    %13 = vector.load %arg3[%c0_6, %c0_7, %c0_8] : memref<2x8x128xf32, #tpu.memory_space<vmem>>, vector<1x8x128xf32>
    %14 = vector.shape_cast %13 : vector<1x8x128xf32> to vector<8x128xf32>
    %15 = vector.shape_cast %12 : vector<8x128xf32> to vector<1x8x128xf32>
    tpu.vector_store %arg3[%c0_6, %c0_7, %c0_8], %15 {strides = array<i32>} : memref<2x8x128xf32, #tpu.memory_space<vmem>>, vector<1x8x128xf32>,
    %16 = vector.broadcast %6 : f32 to vector<8x128xf32>
    %17 = arith.mulf %16, %1 : vector<8x128xf32>
    %18 = vector.broadcast %7 : f32 to vector<8x128xf32>
    %19 = arith.mulf %18, %3 : vector<8x128xf32>
    %20 = arith.addf %17, %19 : vector<8x128xf32>
    %c1_9 = arith.constant 1 : index
    %c0_10 = arith.constant 0 : index
    %c0_11 = arith.constant 0 : index
    %21 = vector.load %arg3[%c1_9, %c0_10, %c0_11] : memref<2x8x128xf32, #tpu.memory_space<vmem>>, vector<1x8x128xf32>
    %22 = vector.shape_cast %21 : vector<1x8x128xf32> to vector<8x128xf32>
    %23 = vector.shape_cast %20 : vector<8x128xf32> to vector<1x8x128xf32>
    tpu.vector_store %arg3[%c1_9, %c0_10, %c0_11], %23 {strides = array<i32>} : memref<2x8x128xf32, #tpu.memory_space<vmem>>, vector<1x8x128xf32>,
    return
  }
  func.func @transform_0(%arg0: i32) -> i32 {
    %c0_i32 = arith.constant 0 : i32
    %c0_i32_0 = arith.constant 0 : i32
    return %c0_i32 : i32
  }
  func.func @transform_1(%arg0: i32) -> (i32, i32, i32) {
    %c0_i32 = arith.constant 0 : i32
    %c0_i32_0 = arith.constant 0 : i32
    %c0_i32_1 = arith.constant 0 : i32
    return %c0_i32, %arg0, %c0_i32_0 : i32, i32, i32
  }
  func.func @transform_2(%arg0: i32) -> (i32, i32, i32) {
    %c0_i32 = arith.constant 0 : i32
    %c0_i32_0 = arith.constant 0 : i32
    %c0_i32_1 = arith.constant 0 : i32
    return %c0_i32, %arg0, %c0_i32_0 : i32, i32, i32
  }
}

</mosaic_0001>

<bundles_post_ra>
// kernel: tpu_custom_call.1
= control target key start
LH: loop header
LB: loop body
LE: loop exit
PB: predicated region body
PF: predicated region fallthrough
CT: control target
= control target key end

     0   :  { %7 = vsyncpa [#allocation5], 0  ;;  %s205_s0 = inlined_call_operand.hbm [shape: f32[4], index: 0, kind: input, shape index: {}]   ;;  %s206_s1 = inlined_call_operand.hbm [shape: f32[2,8,128], index: 1, kind: input, shape index: {}]   ;;  %s207_s2 = inlined_call_operand.hbm [shape: f32[2,8,128], index: 2, kind: output, shape index: {}]  }
   0x1   :  { %8 = vsyncpa [#allocation3], 0 }
   0x2   :  { %9 = vsyncpa [#allocation4], 0  ;;  %s83_s11 = scalar_lea.hbm %s205_s0, 16 }
   0x3   :  { %p84_p0 = scmp.ne.s32.totalorder %s205_s0, %s83_s11  ;;  %p87_p1 = scmp.lt.u32.totalorder %s83_s11, %s205_s0 }
   0x5   :  { %p89_p2 = pnand %p87_p1, %p84_p0 }
   0x7   :  { %92 = shalt.err (!%p89_p2)
}
   0x8   :  { %s143_s16 = smov [#allocation2]   ;;  %s144_s19 = smov [#allocation6]  }
   0x9   :  { %17 = dma.hbm_to_smem %s205_s0, 16, %s143_s16, [#allocation5]  }
   0xa   :  { %s23_s20 = sshll.u32 %s144_s19, 4  ;;  %s93_s23 = scalar_lea.hbm %s206_s1, 256  ;;  %s24_s20 = int_to_ptr.vmem [resolvable:$true] %s23_s20 }
   0xb   :  { %p94_p3 = scmp.ne.s32.totalorder %s206_s1, %s93_s23  ;;  %p97_p4 = scmp.lt.u32.totalorder %s93_s23, %s206_s1 }
   0xd   :  { %p99_p5 = pnand %p97_p4, %p94_p3 }
   0xf   :  { %102 = shalt.err (!%p99_p5)
}
  0x10   :  { %s103_s28 = scalar_lea.vmem %s24_s20, 256  ;;  %p108_p7 = scmp.lt.s32.totalorder %s24_s20, %s24_s20 }
  0x11   :  { %p104_p6 = scmp.ne.s32.totalorder %s24_s20, %s103_s28  ;;  %p109_p8 = scmp.lt.s32.totalorder %s103_s28, %s103_s28 }
  0x13   :  { %p110_p9 = por %p109_p8, %p108_p7 }
  0x15   :  { %p111_p10 = pnand %p110_p9, %p104_p6 }
  0x17   :  { %114 = shalt.err (!%p111_p10)
}
  0x18   :  { %s145_s0 = smov 128   ;;  %s146_s29 = smov 8  }
  0x19   :  { %29 = dma.hbm_to_vmem [thread:$0]  %s206_s1, 256, %s24_s20, [#allocation3], %s145_s0, %s145_s0, %s146_s29  }
  0x1a   :  { %137 = dma.done.wait [#allocation5], 16  }
  0x1b   :  { %138 = vsyncadd [#allocation5], 4294967280 }
  0x1c   :  { %139 = dma.done.wait [#allocation3], 256  }
  0x1d   :  { %140 = vsyncadd [#allocation3], 4294967040 }
  0x1e   :  { %36 = sfence }
  0x1f   :  { %s40_s4 = sld [smem:[#allocation2]]  ;;  %s75_s5 = sld [smem:[#allocation2 + $0x1]]  ;;  %v37_v0 = vld [vmem:[#allocation6] sm:$0xff]  ;;  %v39_v1 = vld [vmem:[#allocation6 + $0x8] sm:$0xff] }
  0x20   :  { %s76_s6 = sld [smem:[#allocation2 + $0x2]]  ;;  %s77_s7 = sld [smem:[#allocation2 + $0x3]] }
  0x21   :  { %s147_s8 = smov [#allocation7]  }
  0x22   :  { %s62_s9 = sshll.u32 %s147_s8, 4  ;;  %s63_s9 = int_to_ptr.vmem [resolvable:$true] %s62_s9 }
  0x23   :  { %s115_s1 = scalar_lea.vmem %s63_s9, 256  ;;  %p120_p12 = scmp.lt.s32.totalorder %s63_s9, %s63_s9 }
  0x24   :  { %p116_p11 = scmp.ne.s32.totalorder %s63_s9, %s115_s1  ;;  %p121_p13 = scmp.lt.s32.totalorder %s115_s1, %s115_s1 }
  0x25   :  { %v44_v2 = vstv %s40_s4  ;;  %v46_v3 = vstv %s75_s5 }
  0x26   :  { %v45_v4 = vmul.f32 %v44_v2, %v37_v0  ;;  %v47_v5 = vmul.f32 %v46_v3, %v39_v1  ;;  %v50_v6 = vstv %s76_s6  ;;  %v52_v7 = vstv %s77_s7  ;;  %p122_p0 = por %p121_p13, %p120_p12 }
  0x27   :  { %v51_v8 = vmul.f32 %v50_v6, %v37_v0  ;;  %v53_v9 = vmul.f32 %v52_v7, %v39_v1 }
  0x28   :  { %v48_v10 = vadd.f32 %v47_v5, %v45_v4  ;;  %p123_p1 = pnand %p122_p0, %p116_p11 }
  0x29   :  { %v54_v11 = vadd.f32 %v53_v9, %v51_v8 }
  0x2a   :  { %49 = vst [vmem:[#allocation7] sm:$0xff] %v48_v10 }
  0x2b   :  { %56 = vst [vmem:[#allocation7 + $0x8] sm:$0xff] %v54_v11 }
  0x2c   :  { %126 = shalt.err (!%p123_p1)
}
  0x2d   :  { %s127_s12 = scalar_lea.hbm %s207_s2, 256 }
  0x2e   :  { %p128_p2 = scmp.ne.s32.totalorder %s207_s2, %s127_s12  ;;  %p131_p3 = scmp.lt.u32.totalorder %s127_s12, %s207_s2 }
  0x30   :  { %p133_p4 = pnand %p131_p3, %p128_p2 }
  0x32   :  { %136 = shalt.err (!%p133_p4)
}
  0x33   :  { %68 = dma.vmem_to_hbm [thread:$0]  %s63_s9, 256, %s207_s2, [#allocation4], %s145_s0, %s145_s0, %s146_s29  }
  0x34   :  { %141 = dma.done.wait [#allocation4], 256  }
  0x35   :  { %142 = vsyncadd [#allocation4], 4294967040 }
  0x36   :  { %72 = vsyncpa [#allocation3], 1 }
  0x37   :  { %73 = vsyncpa [#allocation4], 1 }
  0x38   :  { %74 = vsyncpa [#allocation5], 1 }

</bundles_post_ra>
